<compile_context>
chip_gen: v7x
topology: tpu7x:2x2x1
jax: 0.10.0
libtpu: 0.0.40
codegen_flags: <defaults>
</compile_context>

<pallas_src>
import functools

import jax
import jax.numpy as jnp
from jax import lax
from jax.experimental import pallas as pl
from jax.experimental.pallas import tpu as pltpu


# ---------------------------------------------------------------------------
# Model config (scaled-down BERT)
# ---------------------------------------------------------------------------

VOCAB = 64
TYPE_VOCAB = 2
MAX_POS = 32
HIDDEN = 32
N_HEADS = 2
HEAD_DIM = HIDDEN // N_HEADS
INTERMEDIATE = 64
N_LAYERS = 2
NUM_LABELS = 3
LANE = 128


# ---------------------------------------------------------------------------
# In-kernel helpers (pure functions on values)
# ---------------------------------------------------------------------------

def _layer_norm(x, g, b, eps=1e-12):
    mu = jnp.mean(x, axis=-1, keepdims=True)
    xc = x - mu
    var = jnp.mean(xc * xc, axis=-1, keepdims=True)
    return xc * lax.rsqrt(var + eps) * g + b


def _gelu(x):
    # tanh-approx GELU (BERT intermediate activation)
    return 0.5 * x * (1.0 + jnp.tanh(0.7978845608028654 * (x + 0.044715 * x * x * x)))


# ---------------------------------------------------------------------------
# Pallas kernels
# ---------------------------------------------------------------------------

def _layernorm_kernel(x_ref, g_ref, b_ref, o_ref):
    """Residual-free LayerNorm over the last dim of a (1, S, H) block."""
    x = x_ref[0].astype(jnp.float32)                       # (S, H)
    o_ref[0] = _layer_norm(x, g_ref[...], b_ref[...]).astype(o_ref.dtype)


def _encoder_layer_kernel(x_ref, mask_ref,
                          wq_ref, wk_ref, wv_ref, bq_ref, bk_ref, bv_ref,
                          wo_ref, bo_ref, ln1_g_ref, ln1_b_ref,
                          wi_ref, bi_ref, wo2_ref, bo2_ref, ln2_g_ref, ln2_b_ref,
                          out_ref, *, n_heads, scale):
    """One full BERT encoder layer for a single batch element (grid axis = batch).

    x_ref    : (1, S, H)      activations for this batch element
    mask_ref : (1, 1, S)      additive attention mask
    wq/wk/wv : (nH, H, dh)    per-head QKV projection weights
    bq/bk/bv : (nH, 1, dh)    per-head QKV biases
    wo       : (nH, dh, H)    per-head rows of the attention output projection
    everything else: standard dense / LN params reshaped to 2-D.
    """
    x = x_ref[0].astype(jnp.float32)                       # (S, H)
    mask = mask_ref[0]                                     # (1, S)

    # ---- multi-head self-attention (heads unrolled; no HBM traffic in between) ----
    attn = None
    for h in range(n_heads):
        q = jnp.dot(x, wq_ref[h], preferred_element_type=jnp.float32) + bq_ref[h]   # (S, dh)
        k = jnp.dot(x, wk_ref[h], preferred_element_type=jnp.float32) + bk_ref[h]   # (S, dh)
        v = jnp.dot(x, wv_ref[h], preferred_element_type=jnp.float32) + bv_ref[h]   # (S, dh)

        # scores = q @ k^T (contraction on the last dim of both; no explicit transpose)
        s = lax.dot_general(q, k, (((1,), (1,)), ((), ())),
                            preferred_element_type=jnp.float32) * scale             # (S, S)
        s = s + mask
        s = s - jnp.max(s, axis=-1, keepdims=True)
        p = jnp.exp(s)
        p = p * pl.reciprocal(jnp.sum(p, axis=-1, keepdims=True), approx=True)

        ctx = jnp.dot(p, v, preferred_element_type=jnp.float32)                     # (S, dh)
        contrib = jnp.dot(ctx, wo_ref[h], preferred_element_type=jnp.float32)       # (S, H)
        attn = contrib if attn is None else attn + contrib
    attn = attn + bo_ref[...]

    # ---- add & LayerNorm 1 ----
    h1 = _layer_norm(attn + x, ln1_g_ref[...], ln1_b_ref[...])                      # (S, H)

    # ---- feed-forward (GELU) ----
    ff = jnp.dot(h1, wi_ref[...], preferred_element_type=jnp.float32) + bi_ref[...]  # (S, I)
    ff = _gelu(ff)
    ff = jnp.dot(ff, wo2_ref[...], preferred_element_type=jnp.float32) + bo2_ref[...]  # (S, H)

    # ---- add & LayerNorm 2 ----
    out = _layer_norm(ff + h1, ln2_g_ref[...], ln2_b_ref[...])
    out_ref[0] = out.astype(out_ref.dtype)


def _classifier_kernel(x_ref, w_ref, b_ref, o_ref):
    """logits (lane-padded to a multiple of 128) = x @ w + b."""
    y = jnp.dot(x_ref[...], w_ref[...], preferred_element_type=jnp.float32) + b_ref[...]
    o_ref[...] = y.astype(o_ref.dtype)


# ---------------------------------------------------------------------------
# Pallas wrappers
# ---------------------------------------------------------------------------

def _const_spec(shape):
    """BlockSpec that always maps to block (0, 0, ...) regardless of grid index."""
    zeros = (0,) * len(shape)
    return pl.BlockSpec(shape, lambda b, _z=zeros: _z)


def layer_norm_3d(x, gamma, beta):
    B, S, H = x.shape
    g2 = gamma.reshape(1, H)
    b2 = beta.reshape(1, H)
    return pl.pallas_call(
        _layernorm_kernel,
        out_shape=jax.ShapeDtypeStruct((B, S, H), x.dtype),
        grid=(B,),
        in_specs=[
            pl.BlockSpec((1, S, H), lambda b: (b, 0, 0)),
            _const_spec((1, H)),
            _const_spec((1, H)),
        ],
        out_specs=pl.BlockSpec((1, S, H), lambda b: (b, 0, 0)),
        compiler_params=pltpu.CompilerParams(dimension_semantics=("parallel",)),
    )(x, g2, b2)


def encoder_layer(x, add_mask, lp):
    """x: (B, S, H); add_mask: (B, 1, S) additive mask; lp: layer params dict."""
    B, S, H = x.shape
    nH, dh = N_HEADS, HEAD_DIM
    I = lp["w_i"].shape[1]

    # Split packed QKV / attention-output weights into per-head slabs (pure XLA glue).
    w_qkv, b_qkv = lp["w_qkv"], lp["b_qkv"]
    wq = w_qkv[:, 0 * H:1 * H].reshape(H, nH, dh).transpose(1, 0, 2)   # (nH, H, dh)
    wk = w_qkv[:, 1 * H:2 * H].reshape(H, nH, dh).transpose(1, 0, 2)
    wv = w_qkv[:, 2 * H:3 * H].reshape(H, nH, dh).transpose(1, 0, 2)
    bq = b_qkv[0 * H:1 * H].reshape(nH, 1, dh)                          # (nH, 1, dh)
    bk = b_qkv[1 * H:2 * H].reshape(nH, 1, dh)
    bv = b_qkv[2 * H:3 * H].reshape(nH, 1, dh)
    wo = lp["w_ao"].reshape(nH, dh, H)                                  # (nH, dh, H)
    bo = lp["b_ao"].reshape(1, H)
    ln1_g = lp["ln1_g"].reshape(1, H)
    ln1_b = lp["ln1_b"].reshape(1, H)
    wi = lp["w_i"]
    bi = lp["b_i"].reshape(1, I)
    wo2 = lp["w_o"]
    bo2 = lp["b_o"].reshape(1, H)
    ln2_g = lp["ln2_g"].reshape(1, H)
    ln2_b = lp["ln2_b"].reshape(1, H)

    kern = functools.partial(_encoder_layer_kernel,
                             n_heads=nH, scale=1.0 / (dh ** 0.5))

    return pl.pallas_call(
        kern,
        out_shape=jax.ShapeDtypeStruct((B, S, H), x.dtype),
        grid=(B,),
        in_specs=[
            pl.BlockSpec((1, S, H), lambda b: (b, 0, 0)),   # x
            pl.BlockSpec((1, 1, S), lambda b: (b, 0, 0)),   # additive mask
            _const_spec((nH, H, dh)),                       # wq
            _const_spec((nH, H, dh)),                       # wk
            _const_spec((nH, H, dh)),                       # wv
            _const_spec((nH, 1, dh)),                       # bq
            _const_spec((nH, 1, dh)),                       # bk
            _const_spec((nH, 1, dh)),                       # bv
            _const_spec((nH, dh, H)),                       # wo (attn out proj per head)
            _const_spec((1, H)),                            # bo
            _const_spec((1, H)),                            # ln1_g
            _const_spec((1, H)),                            # ln1_b
            _const_spec((H, I)),                            # w_i
            _const_spec((1, I)),                            # b_i
            _const_spec((I, H)),                            # w_o
            _const_spec((1, H)),                            # b_o
            _const_spec((1, H)),                            # ln2_g
            _const_spec((1, H)),                            # ln2_b
        ],
        out_specs=pl.BlockSpec((1, S, H), lambda b: (b, 0, 0)),
        compiler_params=pltpu.CompilerParams(dimension_semantics=("parallel",)),
    )(x, add_mask, wq, wk, wv, bq, bk, bv, wo, bo,
      ln1_g, ln1_b, wi, bi, wo2, bo2, ln2_g, ln2_b)


def classifier(cls, w, b):
    """cls: (B, H); w: (H, num_labels). Computes lane-padded logits, slices back."""
    B, H = cls.shape
    n = w.shape[1]
    npad = ((n + LANE - 1) // LANE) * LANE
    npad = max(npad, LANE)
    w_pad = jnp.zeros((H, npad), w.dtype).at[:, :n].set(w)
    b_pad = jnp.zeros((1, npad), b.dtype).at[:, :n].set(b.reshape(1, n))
    out = pl.pallas_call(
        _classifier_kernel,
        out_shape=jax.ShapeDtypeStruct((B, npad), cls.dtype),
        in_specs=[
            pl.BlockSpec((B, H), lambda: (0, 0)),
            pl.BlockSpec((H, npad), lambda: (0, 0)),
            pl.BlockSpec((1, npad), lambda: (0, 0)),
        ],
        out_specs=pl.BlockSpec((B, npad), lambda: (0, 0)),
    )(cls, w_pad, b_pad)
    return out[:, :n]


# ---------------------------------------------------------------------------
# Model (small BERT encoder + classifier head)
# ---------------------------------------------------------------------------

def init_params(key):
    def nrm(k, shape, std=0.02):
        return (std * jax.random.normal(k, shape)).astype(jnp.float32)

    keys = iter(jax.random.split(key, 64))
    p = {
        "word_emb": nrm(next(keys), (VOCAB, HIDDEN)),
        "type_emb": nrm(next(keys), (TYPE_VOCAB, HIDDEN)),
        "pos_emb": nrm(next(keys), (MAX_POS, HIDDEN)),
        "emb_ln_g": jnp.ones((HIDDEN,), jnp.float32),
        "emb_ln_b": jnp.zeros((HIDDEN,), jnp.float32),
        "layers": [],
        "cls_w": nrm(next(keys), (HIDDEN, NUM_LABELS)),
        "cls_b": jnp.zeros((NUM_LABELS,), jnp.float32),
    }
    for _ in range(N_LAYERS):
        p["layers"].append({
            "w_qkv": nrm(next(keys), (HIDDEN, 3 * HIDDEN)),
            "b_qkv": jnp.zeros((3 * HIDDEN,), jnp.float32),
            "w_ao": nrm(next(keys), (HIDDEN, HIDDEN)),
            "b_ao": jnp.zeros((HIDDEN,), jnp.float32),
            "ln1_g": jnp.ones((HIDDEN,), jnp.float32),
            "ln1_b": jnp.zeros((HIDDEN,), jnp.float32),
            "w_i": nrm(next(keys), (HIDDEN, INTERMEDIATE)),
            "b_i": jnp.zeros((INTERMEDIATE,), jnp.float32),
            "w_o": nrm(next(keys), (INTERMEDIATE, HIDDEN)),
            "b_o": jnp.zeros((HIDDEN,), jnp.float32),
            "ln2_g": jnp.ones((HIDDEN,), jnp.float32),
            "ln2_b": jnp.zeros((HIDDEN,), jnp.float32),
        })
    return p


def bert_forward(params, input_ids, token_type_ids, attention_mask):
    B, S = input_ids.shape

    # ---- embeddings (gather is XLA glue; LayerNorm is a residual-free Pallas kernel) ----
    x = (params["word_emb"][input_ids]
         + params["type_emb"][token_type_ids]
         + params["pos_emb"][:S][None, :, :])                  # (B, S, H)
    x = layer_norm_3d(x, params["emb_ln_g"], params["emb_ln_b"])

    # additive attention mask: (B, 1, S)
    add_mask = ((1.0 - attention_mask.astype(jnp.float32)) * -1e9)[:, None, :]

    # ---- encoder layers: one fused Pallas kernel per layer ----
    for lp in params["layers"]:
        x = encoder_layer(x, add_mask, lp)

    # ---- head: dropout (identity at inference) + Linear on CLS token ----
    # TODO(synk): nn.Dropout(0.1) is a no-op in eval mode; training-mode dropout not implemented.
    cls = x[:, 0, :]                                           # (B, H)
    logits = classifier(cls, params["cls_w"], params["cls_b"])  # (B, num_labels)
    return logits


# ---------------------------------------------------------------------------

if __name__ == "__main__":
    key = jax.random.PRNGKey(0)
    pkey, dkey = jax.random.split(key)

    params = init_params(pkey)

    B, S = 2, 8
    input_ids = jax.random.randint(dkey, (B, S), 0, VOCAB, dtype=jnp.int32)
    token_type_ids = jnp.zeros((B, S), jnp.int32)
    attention_mask = jnp.ones((B, S), jnp.int32)

    logits = jax.jit(bert_forward)(params, input_ids, token_type_ids, attention_mask)
    logits = jax.block_until_ready(logits)

    assert logits.shape == (B, NUM_LABELS)
    assert bool(jnp.all(jnp.isfinite(logits)))
    print("KERNEL_OK")
</pallas_src>

<mosaic_0001>
module attributes {stable_mosaic.version = 11 : i64} {
  func.func @_layernorm_kernel(%arg0: i32, %arg1: memref<1x8x32xf32, #tpu.memory_space<vmem>>, %arg2: memref<1x32xf32, #tpu.memory_space<vmem>>, %arg3: memref<1x32xf32, #tpu.memory_space<vmem>>, %arg4: memref<1x8x32xf32, #tpu.memory_space<vmem>>) attributes {dimension_semantics = [#tpu.dimension_semantics<parallel>], iteration_bounds = array<i64: 2>, scalar_prefetch = 0 : i64, scratch_operands = 0 : i64, tpu.core_type = #tpu.core_type<tc>, window_params = [{transform_indices = @transform_0, window_bounds = array<i64: 1, 8, 32>}, {pipeline_mode = #tpu.pipeline_mode<synchronous>, transform_indices = @transform_1, window_bounds = array<i64: 1, 32>}, {pipeline_mode = #tpu.pipeline_mode<synchronous>, transform_indices = @transform_2, window_bounds = array<i64: 1, 32>}, {transform_indices = @transform_3, window_bounds = array<i64: 1, 8, 32>}]} {
    %c0 = arith.constant 0 : index
    %c0_0 = arith.constant 0 : index
    %c0_1 = arith.constant 0 : index
    %0 = vector.load %arg1[%c0, %c0_0, %c0_1] : memref<1x8x32xf32, #tpu.memory_space<vmem>>, vector<1x8x32xf32>
    %1 = vector.shape_cast %0 : vector<1x8x32xf32> to vector<8x32xf32>
    %c0_2 = arith.constant 0 : index
    %c0_3 = arith.constant 0 : index
    %2 = vector.load %arg2[%c0_2, %c0_3] : memref<1x32xf32, #tpu.memory_space<vmem>>, vector<1x32xf32>
    %c0_4 = arith.constant 0 : index
    %c0_5 = arith.constant 0 : index
    %3 = vector.load %arg3[%c0_4, %c0_5] : memref<1x32xf32, #tpu.memory_space<vmem>>, vector<1x32xf32>
    %cst = arith.constant dense<0.000000e+00> : vector<8xf32>
    %4 = vector.multi_reduction <add>, %1, %cst [1] : vector<8x32xf32> to vector<8xf32>
    %5 = vector.shape_cast %4 : vector<8xf32> to vector<8x1xf32>
    %cst_6 = arith.constant 3.200000e+01 : f32
    %6 = vector.broadcast %cst_6 : f32 to vector<8x1xf32>
    %7 = arith.divf %5, %6 : vector<8x1xf32>
    %8 = vector.broadcast %7 : vector<8x1xf32> to vector<8x32xf32>
    %9 = arith.subf %1, %8 : vector<8x32xf32>
    %10 = arith.mulf %9, %9 : vector<8x32xf32>
    %cst_7 = arith.constant dense<0.000000e+00> : vector<8xf32>
    %11 = vector.multi_reduction <add>, %10, %cst_7 [1] : vector<8x32xf32> to vector<8xf32>
    %12 = vector.shape_cast %11 : vector<8xf32> to vector<8x1xf32>
    %cst_8 = arith.constant 3.200000e+01 : f32
    %13 = vector.broadcast %cst_8 : f32 to vector<8x1xf32>
    %14 = arith.divf %12, %13 : vector<8x1xf32>
    %cst_9 = arith.constant 9.99999996E-13 : f32
    %15 = vector.broadcast %cst_9 : f32 to vector<8x1xf32>
    %16 = arith.addf %14, %15 : vector<8x1xf32>
    %17 = math.rsqrt %16 : vector<8x1xf32>
    %18 = vector.broadcast %17 : vector<8x1xf32> to vector<8x32xf32>
    %19 = arith.mulf %9, %18 : vector<8x32xf32>
    %20 = vector.broadcast %2 : vector<1x32xf32> to vector<8x32xf32>
    %21 = arith.mulf %19, %20 : vector<8x32xf32>
    %22 = vector.broadcast %3 : vector<1x32xf32> to vector<8x32xf32>
    %23 = arith.addf %21, %22 : vector<8x32xf32>
    %c0_10 = arith.constant 0 : index
    %c0_11 = arith.constant 0 : index
    %c0_12 = arith.constant 0 : index
    %24 = vector.load %arg4[%c0_10, %c0_11, %c0_12] : memref<1x8x32xf32, #tpu.memory_space<vmem>>, vector<1x8x32xf32>
    %25 = vector.shape_cast %24 : vector<1x8x32xf32> to vector<8x32xf32>
    %26 = vector.shape_cast %23 : vector<8x32xf32> to vector<1x8x32xf32>
    tpu.vector_store %arg4[%c0_10, %c0_11, %c0_12], %26 {strides = array<i32>} : memref<1x8x32xf32, #tpu.memory_space<vmem>>, vector<1x8x32xf32>,
    return
  }
  func.func @transform_0(%arg0: i32) -> (i32, i32, i32) {
    %c0_i32 = arith.constant 0 : i32
    %c0_i32_0 = arith.constant 0 : i32
    %c0_i32_1 = arith.constant 0 : i32
    return %arg0, %c0_i32, %c0_i32_0 : i32, i32, i32
  }
  func.func @transform_1(%arg0: i32) -> (i32, i32) {
    %c0_i32 = arith.constant 0 : i32
    %c0_i32_0 = arith.constant 0 : i32
    %c0_i32_1 = arith.constant 0 : i32
    return %c0_i32, %c0_i32_0 : i32, i32
  }
  func.func @transform_2(%arg0: i32) -> (i32, i32) {
    %c0_i32 = arith.constant 0 : i32
    %c0_i32_0 = arith.constant 0 : i32
    %c0_i32_1 = arith.constant 0 : i32
    return %c0_i32, %c0_i32_0 : i32, i32
  }
  func.func @transform_3(%arg0: i32) -> (i32, i32, i32) {
    %c0_i32 = arith.constant 0 : i32
    %c0_i32_0 = arith.constant 0 : i32
    %c0_i32_1 = arith.constant 0 : i32
    return %arg0, %c0_i32, %c0_i32_0 : i32, i32, i32
  }
}

module attributes {stable_mosaic.version = 11 : i64} {
  func.func @_encoder_layer_kernel(%arg0: i32, %arg1: memref<1x8x32xf32, #tpu.memory_space<vmem>>, %arg2: memref<1x1x8xf32, #tpu.memory_space<vmem>>, %arg3: memref<2x32x16xf32, #tpu.memory_space<vmem>>, %arg4: memref<2x32x16xf32, #tpu.memory_space<vmem>>, %arg5: memref<2x32x16xf32, #tpu.memory_space<vmem>>, %arg6: memref<2x1x16xf32, #tpu.memory_space<vmem>>, %arg7: memref<2x1x16xf32, #tpu.memory_space<vmem>>, %arg8: memref<2x1x16xf32, #tpu.memory_space<vmem>>, %arg9: memref<2x16x32xf32, #tpu.memory_space<vmem>>, %arg10: memref<1x32xf32, #tpu.memory_space<vmem>>, %arg11: memref<1x32xf32, #tpu.memory_space<vmem>>, %arg12: memref<1x32xf32, #tpu.memory_space<vmem>>, %arg13: memref<32x64xf32, #tpu.memory_space<vmem>>, %arg14: memref<1x64xf32, #tpu.memory_space<vmem>>, %arg15: memref<64x32xf32, #tpu.memory_space<vmem>>, %arg16: memref<1x32xf32, #tpu.memory_space<vmem>>, %arg17: memref<1x32xf32, #tpu.memory_space<vmem>>, %arg18: memref<1x32xf32, #tpu.memory_space<vmem>>, %arg19: memref<1x8x32xf32, #tpu.memory_space<vmem>>) attributes {dimension_semantics = [#tpu.dimension_semantics<parallel>], iteration_bounds = array<i64: 2>, scalar_prefetch = 0 : i64, scratch_operands = 0 : i64, tpu.core_type = #tpu.core_type<tc>, window_params = [{transform_indices = @transform_0, window_bounds = array<i64: 1, 8, 32>}, {transform_indices = @transform_1, window_bounds = array<i64: 1, 1, 8>}, {pipeline_mode = #tpu.pipeline_mode<synchronous>, transform_indices = @transform_2, window_bounds = array<i64: 2, 32, 16>}, {pipeline_mode = #tpu.pipeline_mode<synchronous>, transform_indices = @transform_3, window_bounds = array<i64: 2, 32, 16>}, {pipeline_mode = #tpu.pipeline_mode<synchronous>, transform_indices = @transform_4, window_bounds = array<i64: 2, 32, 16>}, {pipeline_mode = #tpu.pipeline_mode<synchronous>, transform_indices = @transform_5, window_bounds = array<i64: 2, 1, 16>}, {pipeline_mode = #tpu.pipeline_mode<synchronous>, transform_indices = @transform_6, window_bounds = array<i64: 2, 1, 16>}, {pipeline_mode = #tpu.pipeline_mode<synchronous>, transform_indices = @transform_7, window_bounds = array<i64: 2, 1, 16>}, {pipeline_mode = #tpu.pipeline_mode<synchronous>, transform_indices = @transform_8, window_bounds = array<i64: 2, 16, 32>}, {pipeline_mode = #tpu.pipeline_mode<synchronous>, transform_indices = @transform_9, window_bounds = array<i64: 1, 32>}, {pipeline_mode = #tpu.pipeline_mode<synchronous>, transform_indices = @transform_10, window_bounds = array<i64: 1, 32>}, {pipeline_mode = #tpu.pipeline_mode<synchronous>, transform_indices = @transform_11, window_bounds = array<i64: 1, 32>}, {pipeline_mode = #tpu.pipeline_mode<synchronous>, transform_indices = @transform_12, window_bounds = array<i64: 32, 64>}, {pipeline_mode = #tpu.pipeline_mode<synchronous>, transform_indices = @transform_13, window_bounds = array<i64: 1, 64>}, {pipeline_mode = #tpu.pipeline_mode<synchronous>, transform_indices = @transform_14, window_bounds = array<i64: 64, 32>}, {pipeline_mode = #tpu.pipeline_mode<synchronous>, transform_indices = @transform_15, window_bounds = array<i64: 1, 32>}, {pipeline_mode = #tpu.pipeline_mode<synchronous>, transform_indices = @transform_16, window_bounds = array<i64: 1, 32>}, {pipeline_mode = #tpu.pipeline_mode<synchronous>, transform_indices = @transform_17, window_bounds = array<i64: 1, 32>}, {transform_indices = @transform_18, window_bounds = array<i64: 1, 8, 32>}]} {
    %c0 = arith.constant 0 : index
    %c0_0 = arith.constant 0 : index
    %c0_1 = arith.constant 0 : index
    %0 = vector.load %arg1[%c0, %c0_0, %c0_1] : memref<1x8x32xf32, #tpu.memory_space<vmem>>, vector<1x8x32xf32>
    %1 = vector.shape_cast %0 : vector<1x8x32xf32> to vector<8x32xf32>
    %c0_2 = arith.constant 0 : index
    %c0_3 = arith.constant 0 : index
    %c0_4 = arith.constant 0 : index
    %2 = vector.load %arg2[%c0_2, %c0_3, %c0_4] : memref<1x1x8xf32, #tpu.memory_space<vmem>>, vector<1x1x8xf32>
    %3 = vector.shape_cast %2 : vector<1x1x8xf32> to vector<1x8xf32>
    %c0_5 = arith.constant 0 : index
    %c0_6 = arith.constant 0 : index
    %c0_7 = arith.constant 0 : index
    %4 = vector.load %arg3[%c0_5, %c0_6, %c0_7] : memref<2x32x16xf32, #tpu.memory_space<vmem>>, vector<1x32x16xf32>
    %5 = vector.shape_cast %4 : vector<1x32x16xf32> to vector<32x16xf32>
    %cst = arith.constant dense<0.000000e+00> : vector<8x16xf32>
    %6 = tpu.matmul %1, %5, %cst {dimension_numbers = #tpu.dot_dimension_numbers<[1], [0], [0], [1], [0, 0, 1, 1], [], []>} : vector<8x32xf32>, vector<32x16xf32>, vector<8x16xf32> -> vector<8x16xf32>
    %c0_8 = arith.constant 0 : index
    %c0_9 = arith.constant 0 : index
    %c0_10 = arith.constant 0 : index
    %7 = vector.load %arg6[%c0_8, %c0_9, %c0_10] : memref<2x1x16xf32, #tpu.memory_space<vmem>>, vector<1x1x16xf32>
    %8 = vector.shape_cast %7 : vector<1x1x16xf32> to vector<1x16xf32>
    %9 = vector.broadcast %8 : vector<1x16xf32> to vector<8x16xf32>
    %10 = arith.addf %6, %9 : vector<8x16xf32>
    %c0_11 = arith.constant 0 : index
    %c0_12 = arith.constant 0 : index
    %c0_13 = arith.constant 0 : index
    %11 = vector.load %arg4[%c0_11, %c0_12, %c0_13] : memref<2x32x16xf32, #tpu.memory_space<vmem>>, vector<1x32x16xf32>
    %12 = vector.shape_cast %11 : vector<1x32x16xf32> to vector<32x16xf32>
    %cst_14 = arith.constant dense<0.000000e+00> : vector<8x16xf32>
    %13 = tpu.matmul %1, %12, %cst_14 {dimension_numbers = #tpu.dot_dimension_numbers<[1], [0], [0], [1], [0, 0, 1, 1], [], []>} : vector<8x32xf32>, vector<32x16xf32>, vector<8x16xf32> -> vector<8x16xf32>
    %c0_15 = arith.constant 0 : index
    %c0_16 = arith.constant 0 : index
    %c0_17 = arith.constant 0 : index
    %14 = vector.load %arg7[%c0_15, %c0_16, %c0_17] : memref<2x1x16xf32, #tpu.memory_space<vmem>>, vector<1x1x16xf32>
    %15 = vector.shape_cast %14 : vector<1x1x16xf32> to vector<1x16xf32>
    %16 = vector.broadcast %15 : vector<1x16xf32> to vector<8x16xf32>
    %17 = arith.addf %13, %16 : vector<8x16xf32>
    %c0_18 = arith.constant 0 : index
    %c0_19 = arith.constant 0 : index
    %c0_20 = arith.constant 0 : index
    %18 = vector.load %arg5[%c0_18, %c0_19, %c0_20] : memref<2x32x16xf32, #tpu.memory_space<vmem>>, vector<1x32x16xf32>
    %19 = vector.shape_cast %18 : vector<1x32x16xf32> to vector<32x16xf32>
    %cst_21 = arith.constant dense<0.000000e+00> : vector<8x16xf32>
    %20 = tpu.matmul %1, %19, %cst_21 {dimension_numbers = #tpu.dot_dimension_numbers<[1], [0], [0], [1], [0, 0, 1, 1], [], []>} : vector<8x32xf32>, vector<32x16xf32>, vector<8x16xf32> -> vector<8x16xf32>
    %c0_22 = arith.constant 0 : index
    %c0_23 = arith.constant 0 : index
    %c0_24 = arith.constant 0 : index
    %21 = vector.load %arg8[%c0_22, %c0_23, %c0_24] : memref<2x1x16xf32, #tpu.memory_space<vmem>>, vector<1x1x16xf32>
    %22 = vector.shape_cast %21 : vector<1x1x16xf32> to vector<1x16xf32>
    %23 = vector.broadcast %22 : vector<1x16xf32> to vector<8x16xf32>
    %24 = arith.addf %20, %23 : vector<8x16xf32>
    %cst_25 = arith.constant dense<0.000000e+00> : vector<8x8xf32>
    %25 = tpu.matmul %10, %17, %cst_25 {dimension_numbers = #tpu.dot_dimension_numbers<[1], [1], [0], [0], [0, 0, 1, 0], [], []>} : vector<8x16xf32>, vector<8x16xf32>, vector<8x8xf32> -> vector<8x8xf32>
    %cst_26 = arith.constant 2.500000e-01 : f32
    %26 = vector.broadcast %cst_26 : f32 to vector<8x8xf32>
    %27 = arith.mulf %25, %26 : vector<8x8xf32>
    %28 = vector.broadcast %3 : vector<1x8xf32> to vector<8x8xf32>
    %29 = arith.addf %27, %28 : vector<8x8xf32>
    %cst_27 = arith.constant dense<0xFF800000> : vector<8xf32>
    %30 = vector.multi_reduction <maximumf>, %29, %cst_27 [1] : vector<8x8xf32> to vector<8xf32>
    %31 = vector.shape_cast %30 : vector<8xf32> to vector<8x1xf32>
    %32 = vector.broadcast %31 : vector<8x1xf32> to vector<8x8xf32>
    %33 = arith.subf %29, %32 : vector<8x8xf32>
    %34 = math.exp %33 : vector<8x8xf32>
    %cst_28 = arith.constant dense<0.000000e+00> : vector<8xf32>
    %35 = vector.multi_reduction <add>, %34, %cst_28 [1] : vector<8x8xf32> to vector<8xf32>
    %36 = vector.shape_cast %35 : vector<8xf32> to vector<8x1xf32>
    %37 = tpu.reciprocal %36 {approx = true} : vector<8x1xf32> -> vector<8x1xf32>
    %38 = vector.broadcast %37 : vector<8x1xf32> to vector<8x8xf32>
    %39 = arith.mulf %34, %38 : vector<8x8xf32>
    %cst_29 = arith.constant dense<0.000000e+00> : vector<8x16xf32>
    %40 = tpu.matmul %39, %24, %cst_29 {dimension_numbers = #tpu.dot_dimension_numbers<[1], [0], [0], [1], [0, 0, 1, 1], [], []>} : vector<8x8xf32>, vector<8x16xf32>, vector<8x16xf32> -> vector<8x16xf32>
    %c0_30 = arith.constant 0 : index
    %c0_31 = arith.constant 0 : index
    %c0_32 = arith.constant 0 : index
    %41 = vector.load %arg9[%c0_30, %c0_31, %c0_32] : memref<2x16x32xf32, #tpu.memory_space<vmem>>, vector<1x16x32xf32>
    %42 = vector.shape_cast %41 : vector<1x16x32xf32> to vector<16x32xf32>
    %cst_33 = arith.constant dense<0.000000e+00> : vector<8x32xf32>
    %43 = tpu.matmul %40, %42, %cst_33 {dimension_numbers = #tpu.dot_dimension_numbers<[1], [0], [0], [1], [0, 0, 1, 1], [], []>} : vector<8x16xf32>, vector<16x32xf32>, vector<8x32xf32> -> vector<8x32xf32>
    %c1 = arith.constant 1 : index
    %c0_34 = arith.constant 0 : index
    %c0_35 = arith.constant 0 : index
    %44 = vector.load %arg3[%c1, %c0_34, %c0_35] : memref<2x32x16xf32, #tpu.memory_space<vmem>>, vector<1x32x16xf32>
    %45 = vector.shape_cast %44 : vector<1x32x16xf32> to vector<32x16xf32>
    %cst_36 = arith.constant dense<0.000000e+00> : vector<8x16xf32>
    %46 = tpu.matmul %1, %45, %cst_36 {dimension_numbers = #tpu.dot_dimension_numbers<[1], [0], [0], [1], [0, 0, 1, 1], [], []>} : vector<8x32xf32>, vector<32x16xf32>, vector<8x16xf32> -> vector<8x16xf32>
    %c1_37 = arith.constant 1 : index
    %c0_38 = arith.constant 0 : index
    %c0_39 = arith.constant 0 : index
    %47 = vector.load %arg6[%c1_37, %c0_38, %c0_39] : memref<2x1x16xf32, #tpu.memory_space<vmem>>, vector<1x1x16xf32>
    %48 = vector.shape_cast %47 : vector<1x1x16xf32> to vector<1x16xf32>
    %49 = vector.broadcast %48 : vector<1x16xf32> to vector<8x16xf32>
    %50 = arith.addf %46, %49 : vector<8x16xf32>
    %c1_40 = arith.constant 1 : index
    %c0_41 = arith.constant 0 : index
    %c0_42 = arith.constant 0 : index
    %51 = vector.load %arg4[%c1_40, %c0_41, %c0_42] : memref<2x32x16xf32, #tpu.memory_space<vmem>>, vector<1x32x16xf32>
    %52 = vector.shape_cast %51 : vector<1x32x16xf32> to vector<32x16xf32>
    %cst_43 = arith.constant dense<0.000000e+00> : vector<8x16xf32>
    %53 = tpu.matmul %1, %52, %cst_43 {dimension_numbers = #tpu.dot_dimension_numbers<[1], [0], [0], [1], [0, 0, 1, 1], [], []>} : vector<8x32xf32>, vector<32x16xf32>, vector<8x16xf32> -> vector<8x16xf32>
    %c1_44 = arith.constant 1 : index
    %c0_45 = arith.constant 0 : index
    %c0_46 = arith.constant 0 : index
    %54 = vector.load %arg7[%c1_44, %c0_45, %c0_46] : memref<2x1x16xf32, #tpu.memory_space<vmem>>, vector<1x1x16xf32>
    %55 = vector.shape_cast %54 : vector<1x1x16xf32> to vector<1x16xf32>
    %56 = vector.broadcast %55 : vector<1x16xf32> to vector<8x16xf32>
    %57 = arith.addf %53, %56 : vector<8x16xf32>
    %c1_47 = arith.constant 1 : index
    %c0_48 = arith.constant 0 : index
    %c0_49 = arith.constant 0 : index
    %58 = vector.load %arg5[%c1_47, %c0_48, %c0_49] : memref<2x32x16xf32, #tpu.memory_space<vmem>>, vector<1x32x16xf32>
    %59 = vector.shape_cast %58 : vector<1x32x16xf32> to vector<32x16xf32>
    %cst_50 = arith.constant dense<0.000000e+00> : vector<8x16xf32>
    %60 = tpu.matmul %1, %59, %cst_50 {dimension_numbers = #tpu.dot_dimension_numbers<[1], [0], [0], [1], [0, 0, 1, 1], [], []>} : vector<8x32xf32>, vector<32x16xf32>, vector<8x16xf32> -> vector<8x16xf32>
    %c1_51 = arith.constant 1 : index
    %c0_52 = arith.constant 0 : index
    %c0_53 = arith.constant 0 : index
    %61 = vector.load %arg8[%c1_51, %c0_52, %c0_53] : memref<2x1x16xf32, #tpu.memory_space<vmem>>, vector<1x1x16xf32>
    %62 = vector.shape_cast %61 : vector<1x1x16xf32> to vector<1x16xf32>
    %63 = vector.broadcast %62 : vector<1x16xf32> to vector<8x16xf32>
    %64 = arith.addf %60, %63 : vector<8x16xf32>
    %cst_54 = arith.constant dense<0.000000e+00> : vector<8x8xf32>
    %65 = tpu.matmul %50, %57, %cst_54 {dimension_numbers = #tpu.dot_dimension_numbers<[1], [1], [0], [0], [0, 0, 1, 0], [], []>} : vector<8x16xf32>, vector<8x16xf32>, vector<8x8xf32> -> vector<8x8xf32>
    %cst_55 = arith.constant 2.500000e-01 : f32
    %66 = vector.broadcast %cst_55 : f32 to vector<8x8xf32>
    %67 = arith.mulf %65, %66 : vector<8x8xf32>
    %68 = vector.broadcast %3 : vector<1x8xf32> to vector<8x8xf32>
    %69 = arith.addf %67, %68 : vector<8x8xf32>
    %cst_56 = arith.constant dense<0xFF800000> : vector<8xf32>
    %70 = vector.multi_reduction <maximumf>, %69, %cst_56 [1] : vector<8x8xf32> to vector<8xf32>
    %71 = vector.shape_cast %70 : vector<8xf32> to vector<8x1xf32>
    %72 = vector.broadcast %71 : vector<8x1xf32> to vector<8x8xf32>
    %73 = arith.subf %69, %72 : vector<8x8xf32>
    %74 = math.exp %73 : vector<8x8xf32>
    %cst_57 = arith.constant dense<0.000000e+00> : vector<8xf32>
    %75 = vector.multi_reduction <add>, %74, %cst_57 [1] : vector<8x8xf32> to vector<8xf32>
    %76 = vector.shape_cast %75 : vector<8xf32> to vector<8x1xf32>
    %77 = tpu.reciprocal %76 {approx = true} : vector<8x1xf32> -> vector<8x1xf32>
    %78 = vector.broadcast %77 : vector<8x1xf32> to vector<8x8xf32>
    %79 = arith.mulf %74, %78 : vector<8x8xf32>
    %cst_58 = arith.constant dense<0.000000e+00> : vector<8x16xf32>
    %80 = tpu.matmul %79, %64, %cst_58 {dimension_numbers = #tpu.dot_dimension_numbers<[1], [0], [0], [1], [0, 0, 1, 1], [], []>} : vector<8x8xf32>, vector<8x16xf32>, vector<8x16xf32> -> vector<8x16xf32>
    %c1_59 = arith.constant 1 : index
    %c0_60 = arith.constant 0 : index
    %c0_61 = arith.constant 0 : index
    %81 = vector.load %arg9[%c1_59, %c0_60, %c0_61] : memref<2x16x32xf32, #tpu.memory_space<vmem>>, vector<1x16x32xf32>
    %82 = vector.shape_cast %81 : vector<1x16x32xf32> to vector<16x32xf32>
    %cst_62 = arith.constant dense<0.000000e+00> : vector<8x32xf32>
    %83 = tpu.matmul %80, %82, %cst_62 {dimension_numbers = #tpu.dot_dimension_numbers<[1], [0], [0], [1], [0, 0, 1, 1], [], []>} : vector<8x16xf32>, vector<16x32xf32>, vector<8x32xf32> -> vector<8x32xf32>
    %84 = arith.addf %43, %83 : vector<8x32xf32>
    %c0_63 = arith.constant 0 : index
    %c0_64 = arith.constant 0 : index
    %85 = vector.load %arg10[%c0_63, %c0_64] : memref<1x32xf32, #tpu.memory_space<vmem>>, vector<1x32xf32>
    %86 = vector.broadcast %85 : vector<1x32xf32> to vector<8x32xf32>
    %87 = arith.addf %84, %86 : vector<8x32xf32>
    %88 = arith.addf %87, %1 : vector<8x32xf32>
    %c0_65 = arith.constant 0 : index
    %c0_66 = arith.constant 0 : index
    %89 = vector.load %arg11[%c0_65, %c0_66] : memref<1x32xf32, #tpu.memory_space<vmem>>, vector<1x32xf32>
    %c0_67 = arith.constant 0 : index
    %c0_68 = arith.constant 0 : index
    %90 = vector.load %arg12[%c0_67, %c0_68] : memref<1x32xf32, #tpu.memory_space<vmem>>, vector<1x32xf32>
    %cst_69 = arith.constant dense<0.000000e+00> : vector<8xf32>
    %91 = vector.multi_reduction <add>, %88, %cst_69 [1] : vector<8x32xf32> to vector<8xf32>
    %92 = vector.shape_cast %91 : vector<8xf32> to vector<8x1xf32>
    %cst_70 = arith.constant 3.200000e+01 : f32
    %93 = vector.broadcast %cst_70 : f32 to vector<8x1xf32>
    %94 = arith.divf %92, %93 : vector<8x1xf32>
    %95 = vector.broadcast %94 : vector<8x1xf32> to vector<8x32xf32>
    %96 = arith.subf %88, %95 : vector<8x32xf32>
    %97 = arith.mulf %96, %96 : vector<8x32xf32>
    %cst_71 = arith.constant dense<0.000000e+00> : vector<8xf32>
    %98 = vector.multi_reduction <add>, %97, %cst_71 [1] : vector<8x32xf32> to vector<8xf32>
    %99 = vector.shape_cast %98 : vector<8xf32> to vector<8x1xf32>
    %cst_72 = arith.constant 3.200000e+01 : f32
    %100 = vector.broadcast %cst_72 : f32 to vector<8x1xf32>
    %101 = arith.divf %99, %100 : vector<8x1xf32>
    %cst_73 = arith.constant 9.99999996E-13 : f32
    %102 = vector.broadcast %cst_73 : f32 to vector<8x1xf32>
    %103 = arith.addf %101, %102 : vector<8x1xf32>
    %104 = math.rsqrt %103 : vector<8x1xf32>
    %105 = vector.broadcast %104 : vector<8x1xf32> to vector<8x32xf32>
    %106 = arith.mulf %96, %105 : vector<8x32xf32>
    %107 = vector.broadcast %89 : vector<1x32xf32> to vector<8x32xf32>
    %108 = arith.mulf %106, %107 : vector<8x32xf32>
    %109 = vector.broadcast %90 : vector<1x32xf32> to vector<8x32xf32>
    %110 = arith.addf %108, %109 : vector<8x32xf32>
    %c0_74 = arith.constant 0 : index
    %c0_75 = arith.constant 0 : index
    %111 = vector.load %arg13[%c0_74, %c0_75] : memref<32x64xf32, #tpu.memory_space<vmem>>, vector<32x64xf32>
    %cst_76 = arith.constant dense<0.000000e+00> : vector<8x64xf32>
    %112 = tpu.matmul %110, %111, %cst_76 {dimension_numbers = #tpu.dot_dimension_numbers<[1], [0], [0], [1], [0, 0, 1, 1], [], []>} : vector<8x32xf32>, vector<32x64xf32>, vector<8x64xf32> -> vector<8x64xf32>
    %c0_77 = arith.constant 0 : index
    %c0_78 = arith.constant 0 : index
    %113 = vector.load %arg14[%c0_77, %c0_78] : memref<1x64xf32, #tpu.memory_space<vmem>>, vector<1x64xf32>
    %114 = vector.broadcast %113 : vector<1x64xf32> to vector<8x64xf32>
    %115 = arith.addf %112, %114 : vector<8x64xf32>
    %cst_79 = arith.constant 5.000000e-01 : f32
    %116 = vector.broadcast %cst_79 : f32 to vector<8x64xf32>
    %117 = arith.mulf %116, %115 : vector<8x64xf32>
    %cst_80 = arith.constant 4.471500e-02 : f32
    %118 = vector.broadcast %cst_80 : f32 to vector<8x64xf32>
    %119 = arith.mulf %118, %115 : vector<8x64xf32>
    %120 = arith.mulf %119, %115 : vector<8x64xf32>
    %121 = arith.mulf %120, %115 : vector<8x64xf32>
    %122 = arith.addf %115, %121 : vector<8x64xf32>
    %cst_81 = arith.constant 0.797884583 : f32
    %123 = vector.broadcast %cst_81 : f32 to vector<8x64xf32>
    %124 = arith.mulf %123, %122 : vector<8x64xf32>
    %125 = math.tanh %124 : vector<8x64xf32>
    %cst_82 = arith.constant 1.000000e+00 : f32
    %126 = vector.broadcast %cst_82 : f32 to vector<8x64xf32>
    %127 = arith.addf %126, %125 : vector<8x64xf32>
    %128 = arith.mulf %117, %127 : vector<8x64xf32>
    %c0_83 = arith.constant 0 : index
    %c0_84 = arith.constant 0 : index
    %129 = vector.load %arg15[%c0_83, %c0_84] : memref<64x32xf32, #tpu.memory_space<vmem>>, vector<64x32xf32>
    %cst_85 = arith.constant dense<0.000000e+00> : vector<8x32xf32>
    %130 = tpu.matmul %128, %129, %cst_85 {dimension_numbers = #tpu.dot_dimension_numbers<[1], [0], [0], [1], [0, 0, 1, 1], [], []>} : vector<8x64xf32>, vector<64x32xf32>, vector<8x32xf32> -> vector<8x32xf32>
    %c0_86 = arith.constant 0 : index
    %c0_87 = arith.constant 0 : index
    %131 = vector.load %arg16[%c0_86, %c0_87] : memref<1x32xf32, #tpu.memory_space<vmem>>, vector<1x32xf32>
    %132 = vector.broadcast %131 : vector<1x32xf32> to vector<8x32xf32>
    %133 = arith.addf %130, %132 : vector<8x32xf32>
    %134 = arith.addf %133, %110 : vector<8x32xf32>
    %c0_88 = arith.constant 0 : index
    %c0_89 = arith.constant 0 : index
    %135 = vector.load %arg17[%c0_88, %c0_89] : memref<1x32xf32, #tpu.memory_space<vmem>>, vector<1x32xf32>
    %c0_90 = arith.constant 0 : index
    %c0_91 = arith.constant 0 : index
    %136 = vector.load %arg18[%c0_90, %c0_91] : memref<1x32xf32, #tpu.memory_space<vmem>>, vector<1x32xf32>
    %cst_92 = arith.constant dense<0.000000e+00> : vector<8xf32>
    %137 = vector.multi_reduction <add>, %134, %cst_92 [1] : vector<8x32xf32> to vector<8xf32>
    %138 = vector.shape_cast %137 : vector<8xf32> to vector<8x1xf32>
    %cst_93 = arith.constant 3.200000e+01 : f32
    %139 = vector.broadcast %cst_93 : f32 to vector<8x1xf32>
    %140 = arith.divf %138, %139 : vector<8x1xf32>
    %141 = vector.broadcast %140 : vector<8x1xf32> to vector<8x32xf32>
    %142 = arith.subf %134, %141 : vector<8x32xf32>
    %143 = arith.mulf %142, %142 : vector<8x32xf32>
    %cst_94 = arith.constant dense<0.000000e+00> : vector<8xf32>
    %144 = vector.multi_reduction <add>, %143, %cst_94 [1] : vector<8x32xf32> to vector<8xf32>
    %145 = vector.shape_cast %144 : vector<8xf32> to vector<8x1xf32>
    %cst_95 = arith.constant 3.200000e+01 : f32
    %146 = vector.broadcast %cst_95 : f32 to vector<8x1xf32>
    %147 = arith.divf %145, %146 : vector<8x1xf32>
    %cst_96 = arith.constant 9.99999996E-13 : f32
    %148 = vector.broadcast %cst_96 : f32 to vector<8x1xf32>
    %149 = arith.addf %147, %148 : vector<8x1xf32>
    %150 = math.rsqrt %149 : vector<8x1xf32>
    %151 = vector.broadcast %150 : vector<8x1xf32> to vector<8x32xf32>
    %152 = arith.mulf %142, %151 : vector<8x32xf32>
    %153 = vector.broadcast %135 : vector<1x32xf32> to vector<8x32xf32>
    %154 = arith.mulf %152, %153 : vector<8x32xf32>
    %155 = vector.broadcast %136 : vector<1x32xf32> to vector<8x32xf32>
    %156 = arith.addf %154, %155 : vector<8x32xf32>
    %c0_97 = arith.constant 0 : index
    %c0_98 = arith.constant 0 : index
    %c0_99 = arith.constant 0 : index
    %157 = vector.load %arg19[%c0_97, %c0_98, %c0_99] : memref<1x8x32xf32, #tpu.memory_space<vmem>>, vector<1x8x32xf32>
    %158 = vector.shape_cast %157 : vector<1x8x32xf32> to vector<8x32xf32>
    %159 = vector.shape_cast %156 : vector<8x32xf32> to vector<1x8x32xf32>
    tpu.vector_store %arg19[%c0_97, %c0_98, %c0_99], %159 {strides = array<i32>} : memref<1x8x32xf32, #tpu.memory_space<vmem>>, vector<1x8x32xf32>,
    return
  }
  func.func @transform_0(%arg0: i32) -> (i32, i32, i32) {
    %c0_i32 = arith.constant 0 : i32
    %c0_i32_0 = arith.constant 0 : i32
    %c0_i32_1 = arith.constant 0 : i32
    return %arg0, %c0_i32, %c0_i32_0 : i32, i32, i32
  }
  func.func @transform_1(%arg0: i32) -> (i32, i32, i32) {
    %c0_i32 = arith.constant 0 : i32
    %c0_i32_0 = arith.constant 0 : i32
    %c0_i32_1 = arith.constant 0 : i32
    return %arg0, %c0_i32, %c0_i32_0 : i32, i32, i32
  }
  func.func @transform_2(%arg0: i32) -> (i32, i32, i32) {
    %c0_i32 = arith.constant 0 : i32
    %c0_i32_0 = arith.constant 0 : i32
    %c0_i32_1 = arith.constant 0 : i32
    %c0_i32_2 = arith.constant 0 : i32
    return %c0_i32, %c0_i32_0, %c0_i32_1 : i32, i32, i32
  }
  func.func @transform_3(%arg0: i32) -> (i32, i32, i32) {
    %c0_i32 = arith.constant 0 : i32
    %c0_i32_0 = arith.constant 0 : i32
    %c0_i32_1 = arith.constant 0 : i32
    %c0_i32_2 = arith.constant 0 : i32
    return %c0_i32, %c0_i32_0, %c0_i32_1 : i32, i32, i32
  }
  func.func @transform_4(%arg0: i32) -> (i32, i32, i32) {
    %c0_i32 = arith.constant 0 : i32
    %c0_i32_0 = arith.constant 0 : i32
    %c0_i32_1 = arith.constant 0 : i32
    %c0_i32_2 = arith.constant 0 : i32
    return %c0_i32, %c0_i32_0, %c0_i32_1 : i32, i32, i32
  }
  func.func @transform_5(%arg0: i32) -> (i32, i32, i32) {
    %c0_i32 = arith.constant 0 : i32
    %c0_i32_0 = arith.constant 0 : i32
    %c0_i32_1 = arith.constant 0 : i32
    %c0_i32_2 = arith.constant 0 : i32
    return %c0_i32, %c0_i32_0, %c0_i32_1 : i32, i32, i32
  }
  func.func @transform_6(%arg0: i32) -> (i32, i32, i32) {
    %c0_i32 = arith.constant 0 : i32
    %c0_i32_0 = arith.constant 0 : i32
    %c0_i32_1 = arith.constant 0 : i32
    %c0_i32_2 = arith.constant 0 : i32
    return %c0_i32, %c0_i32_0, %c0_i32_1 : i32, i32, i32
  }
  func.func @transform_7(%arg0: i32) -> (i32, i32, i32) {
    %c0_i32 = arith.constant 0 : i32
    %c0_i32_0 = arith.constant 0 : i32
    %c0_i32_1 = arith.constant 0 : i32
    %c0_i32_2 = arith.constant 0 : i32
    return %c0_i32, %c0_i32_0, %c0_i32_1 : i32, i32, i32
  }
  func.func @transform_8(%arg0: i32) -> (i32, i32, i32) {
    %c0_i32 = arith.constant 0 : i32
    %c0_i32_0 = arith.constant 0 : i32
    %c0_i32_1 = arith.constant 0 : i32
    %c0_i32_2 = arith.constant 0 : i32
    return %c0_i32, %c0_i32_0, %c0_i32_1 : i32, i32, i32
  }
  func.func @transform_9(%arg0: i32) -> (i32, i32) {
    %c0_i32 = arith.constant 0 : i32
    %c0_i32_0 = arith.constant 0 : i32
    %c0_i32_1 = arith.constant 0 : i32
    return %c0_i32, %c0_i32_0 : i32, i32
  }
  func.func @transform_10(%arg0: i32) -> (i32, i32) {
    %c0_i32 = arith.constant 0 : i32
    %c0_i32_0 = arith.constant 0 : i32
    %c0_i32_1 = arith.constant 0 : i32
    return %c0_i32, %c0_i32_0 : i32, i32
  }
  func.func @transform_11(%arg0: i32) -> (i32, i32) {
    %c0_i32 = arith.constant 0 : i32
    %c0_i32_0 = arith.constant 0 : i32
    %c0_i32_1 = arith.constant 0 : i32
    return %c0_i32, %c0_i32_0 : i32, i32
  }
  func.func @transform_12(%arg0: i32) -> (i32, i32) {
    %c0_i32 = arith.constant 0 : i32
    %c0_i32_0 = arith.constant 0 : i32
    %c0_i32_1 = arith.constant 0 : i32
    return %c0_i32, %c0_i32_0 : i32, i32
  }
  func.func @transform_13(%arg0: i32) -> (i32, i32) {
    %c0_i32 = arith.constant 0 : i32
    %c0_i32_0 = arith.constant 0 : i32
    %c0_i32_1 = arith.constant 0 : i32
    return %c0_i32, %c0_i32_0 : i32, i32
  }
  func.func @transform_14(%arg0: i32) -> (i32, i32) {
    %c0_i32 = arith.constant 0 : i32
    %c0_i32_0 = arith.constant 0 : i32
    %c0_i32_1 = arith.constant 0 : i32
    return %c0_i32, %c0_i32_0 : i32, i32
  }
  func.func @transform_15(%arg0: i32) -> (i32, i32) {
    %c0_i32 = arith.constant 0 : i32
    %c0_i32_0 = arith.constant 0 : i32
    %c0_i32_1 = arith.constant 0 : i32
    return %c0_i32, %c0_i32_0 : i32, i32
  }
  func.func @transform_16(%arg0: i32) -> (i32, i32) {
    %c0_i32 = arith.constant 0 : i32
    %c0_i32_0 = arith.constant 0 : i32
    %c0_i32_1 = arith.constant 0 : i32
    return %c0_i32, %c0_i32_0 : i32, i32
  }
  func.func @transform_17(%arg0: i32) -> (i32, i32) {
    %c0_i32 = arith.constant 0 : i32
    %c0_i32_0 = arith.constant 0 : i32
    %c0_i32_1 = arith.constant 0 : i32
    return %c0_i32, %c0_i32_0 : i32, i32
  }
  func.func @transform_18(%arg0: i32) -> (i32, i32, i32) {
    %c0_i32 = arith.constant 0 : i32
    %c0_i32_0 = arith.constant 0 : i32
    %c0_i32_1 = arith.constant 0 : i32
    return %arg0, %c0_i32, %c0_i32_0 : i32, i32, i32
  }
}

module attributes {stable_mosaic.version = 11 : i64} {
  func.func @_classifier_kernel(%arg0: memref<2x32xf32, #tpu.memory_space<vmem>>, %arg1: memref<32x128xf32, #tpu.memory_space<vmem>>, %arg2: memref<1x128xf32, #tpu.memory_space<vmem>>, %arg3: memref<2x128xf32, #tpu.memory_space<vmem>>) attributes {dimension_semantics = [], scalar_prefetch = 0 : i64, scratch_operands = 0 : i64, tpu.core_type = #tpu.core_type<tc>} {
    %c0 = arith.constant 0 : index
    %c0_0 = arith.constant 0 : index
    %0 = vector.load %arg0[%c0, %c0_0] : memref<2x32xf32, #tpu.memory_space<vmem>>, vector<2x32xf32>
    %c0_1 = arith.constant 0 : index
    %c0_2 = arith.constant 0 : index
    %1 = vector.load %arg1[%c0_1, %c0_2] : memref<32x128xf32, #tpu.memory_space<vmem>>, vector<32x128xf32>
    %cst = arith.constant dense<0.000000e+00> : vector<2x128xf32>
    %2 = tpu.matmul %0, %1, %cst {dimension_numbers = #tpu.dot_dimension_numbers<[1], [0], [0], [1], [0, 0, 1, 1], [], []>} : vector<2x32xf32>, vector<32x128xf32>, vector<2x128xf32> -> vector<2x128xf32>
    %c0_3 = arith.constant 0 : index
    %c0_4 = arith.constant 0 : index
    %3 = vector.load %arg2[%c0_3, %c0_4] : memref<1x128xf32, #tpu.memory_space<vmem>>, vector<1x128xf32>
    %4 = vector.broadcast %3 : vector<1x128xf32> to vector<2x128xf32>
    %5 = arith.addf %2, %4 : vector<2x128xf32>
    %c0_5 = arith.constant 0 : index
    %c0_6 = arith.constant 0 : index
    %6 = vector.load %arg3[%c0_5, %c0_6] : memref<2x128xf32, #tpu.memory_space<vmem>>, vector<2x128xf32>
    tpu.vector_store %arg3[%c0_5, %c0_6], %5 {strides = array<i32>} : memref<2x128xf32, #tpu.memory_space<vmem>>, vector<2x128xf32>,
    return
  }
}

</mosaic_0001>

<bundles_post_ra>
// kernel: bert_forward.7
= control target key start
LH: loop header
LB: loop body
LE: loop exit
PB: predicated region body
PF: predicated region fallthrough
CT: control target
= control target key end

     0   :  { %v168_v3 = vmov 0.0|0.0   ;;  %vm169_vm0 = vmmov 0   ;;  %v170_v6 = vmov 0.0   ;;  %s222_s0 = inlined_call_operand.vmem [shape: f32[2,32], index: 0, kind: input, shape index: {}]   ;;  %s223_s1 = inlined_call_operand.vmem [shape: f32[32,128], index: 1, kind: input, shape index: {}]   ;;  %s224_s2 = inlined_call_operand.vmem [shape: f32[1,128], index: 2, kind: input, shape index: {}]   ;;  %s225_s3 = inlined_call_operand.hbm [shape: f32[2,128], index: 3, kind: output, shape index: {}]  }
   0x1   :  { %v16_v0 = vld [vmem:[%s223_s1] sm:$0xff]  ;;  %v17_v1 = vld [vmem:[%s223_s1 + $0x8] sm:$0xff]  ;;  %v18_v2 = vld [vmem:[%s223_s1 + $0x10] sm:$0xff]  ;;  %134 = vmatprep.subr.bf16.mxu0 %v168_v3  ;;  %131 = vmatprep.mubr.msk.f32.mxu0 %vm169_vm0, %v170_v6 }
   0x2   :  { %v135_v4 = vpack.c.bf16 %v17_v1, %v16_v0  ;;  %v19_v5 = vld [vmem:[%s223_s1 + $0x18] sm:$0xff] }
   0x3   :  { %8 = vsyncpa [#allocation3], 0  ;;  %v138_v7 = vpack.c.bf16 %v19_v5, %v18_v2  ;;  %v15_v8 = vld [vmem:[%s222_s0] sm:$0x3]  ;;  %vm27_vm1 = vcmask 261120   ;;  %s171_s24 = smov [#allocation2]  }
   0x4   :  { %136 = vmatpush3.bf16.msra.mxu0 %v135_v4  ;;  %v116_v9 = vld [vmem:[%s224_s2] ss:$0 sm:$0xff]  ;;  %s108_s1 = sshll.u32 %s171_s24, 4  ;;  %s109_s1 = int_to_ptr.vmem [resolvable:$true] %s108_s1 }
   0x5   :  { %137 = vmatprep.subr.bf16.mxu0 %v168_v3  ;;  %s144_s25 = scalar_lea.vmem %s109_s1, 32  ;;  %p149_p1 = scmp.lt.s32.totalorder %s109_s1, %s109_s1 }
   0x6   :  { %p145_p0 = scmp.ne.s32.totalorder %s109_s1, %s144_s25  ;;  %p150_p2 = scmp.lt.s32.totalorder %s144_s25, %s144_s25 }
   0x8   :  { %139 = vmatpush3.bf16.msra.mxu0 %v138_v7  ;;  %p151_p3 = por %p150_p2, %p149_p1 }
   0xa   :  { %p152_p4 = pnand %p151_p3, %p145_p0 }
   0xb   :  { %132 = vmatmul.mubr.msk.f32.vlgmr.msra.gmra.mrb[0].mxu0 %vm27_vm1, %v15_v8 }
  0xde   :  { %v97_v10 = vpop.f32.mrb[0].mxu0 }
  0xdf   :  { %v98_v11 = vadd.f32 %v116_v9, %v97_v10  ;;  %v133_v12 = vpop.f32.mrb[1].mxu0 }
  0xe1   :  { %101 = vst [vmem:[#allocation2] sm:$0x3] %v98_v11 }
  0xe2   :  { %155 = shalt.err (!%p152_p4)
}
  0xe3   :  { %s156_s27 = scalar_lea.hbm %s225_s3, 32 }
  0xe4   :  { %p157_p5 = scmp.ne.s32.totalorder %s225_s3, %s156_s27  ;;  %p160_p6 = scmp.lt.u32.totalorder %s156_s27, %s225_s3 }
  0xe6   :  { %p162_p7 = pnand %p160_p6, %p157_p5 }
  0xe8   :  { %165 = shalt.err (!%p162_p7)
}
  0xe9   :  { %111 = dma.vmem_to_hbm [thread:$0]  %s109_s1, 32, %s225_s3, [#allocation3]  }
  0xea   :  { %166 = dma.done.wait [#allocation3], 32  }
  0xeb   :  { %167 = vsyncadd [#allocation3], 4294967264 }
  0xec   :  { %115 = vsyncpa [#allocation3], 1 }

// kernel: bert_forward.4
= control target key start
LH: loop header
LB: loop body
LE: loop exit
PB: predicated region body
PF: predicated region fallthrough
CT: control target
= control target key end

     0   :  { %s301_s12 = smov 0   ;;  %s327_s0 = inlined_call_operand.vmem [shape: f32[2,8,32], index: 0, kind: input, shape index: {}]   ;;  %s328_s1 = inlined_call_operand.vmem [shape: f32[1,32], index: 1, kind: input, shape index: {}]   ;;  %s329_s2 = inlined_call_operand.vmem [shape: f32[1,32], index: 2, kind: input, shape index: {}]   ;;  %s330_s3 = inlined_call_operand.vmem [shape: f32[2,8,32], index: 3, kind: output, shape index: {}]  }
   0x1 LB: > { %s252_s13 = sadd.s32 4294967295, %s279_s12   ;;  %p256_p0 = scmp.ge.s32.totalorder %s279_s12, 1  ;;  %s279_s12 = sphi %s301_s12, %s13_s12  }
   0x2   : > { %p136_p1 = scmp.lt.s32.totalorder %s279_s12, 3 }
   0x4   : > { %p137_p2 = pnand %p256_p0, %p136_p1 }
   0x5   : > { %p158_p3 = scmp.lt.s32.totalorder (!%p137_p2), %s252_s13, 1  ;;  %vm169_vm0 = vcmask (!%p137_p2), 261120   ;;  %v259_v11 = vld [vmem:[%s328_s1] ss:$0 sm:$0xff] (!%p137_p2) }
   0x6   : > { %140 = sbr.rel (%p137_p2) target bundleno = 331 (0x14b), region = 32  ;;  %v260_v13 = vld [vmem:[%s329_s2] ss:$0 sm:$0xff] (!%p137_p2) }
   0xd   : > { %s332_s13 = smov (!%p158_p3, %s252_s13), 1 }
   0xe   : > { %s257_s14 = sshll.u32 %s332_s13, 3 }
   0xf   : > { %s161_s17 = scalar_lea.vmem %s327_s0, %s257_s14  ;;  %s165_s24 = scalar_lea.vmem %s330_s3, %s257_s14 }
  0x10   : > { %v166_v0 = vld [vmem:[%s161_s17] sm:$0xff] }
  0x11   : > { %v170_v1 = vsel %vm169_vm0, %v166_v0, 0.0 }
  0x12   : > { %171 = vadd.xlane.f32.xlu0 %v170_v1 }
  0x9f   : > { %v172_v2 = vpop.xlane.xlu0 %171 }
  0xa0   : > { %v174_v3 = vmul.f32 0.03125, %v172_v2 }
  0xa2   : > { %v175_v4 = vsub.f32 %v166_v0, %v174_v3 }
  0xa4   : > { %v176_v5 = vmul.f32 %v175_v4, %v175_v4 }
  0xa6   : > { %v177_v6 = vsel %vm169_vm0, %v176_v5, 0.0 }
  0xa7   : > { %178 = vadd.xlane.f32.xlu0 %v177_v6 }
 0x134   : > { %v179_v7 = vpop.xlane.xlu0 %178 }
 0x135   : > { %v180_v8 = vmul.f32 0.03125, %v179_v7 }
 0x137   : > { %v181_v9 = vadd.f32 1e-12, %v180_v8 }
 0x139   : > { %271 = vrsqrt.f32 %v181_v9 }
 0x143   : > { %v272_v10 = vpop.eup %271 }
 0x144   : > { %v183_v12 = vmul.f32 %v272_v10, %v175_v4 }
 0x146   : > { %v190_v14 = vmul.f32 %v259_v11, %v183_v12 }
 0x148   : > { %v197_v15 = vadd.f32 %v260_v13, %v190_v14 }
 0x14a   : > { %198 = vst.msk [vmem:[%s165_s24] sm:$0xff] %vm169_vm0, %v197_v15 }
 0x14b PF: > { %s13_s12 = sadd.s32 1, %s279_s12  }
 0x14c   : > { %p10_p4 = scmp.ge.s32.totalorder %s13_s12, 4  }
 0x14e   :  { %12 = sbr.rel (!%p10_p4) target bundleno = 1 (0x1), region = 62 }

// kernel: bert_forward.5
= control target key start
LH: loop header
LB: loop body
LE: loop exit
PB: predicated region body
PF: predicated region fallthrough
CT: control target
= control target key end

     0   :  { %s2315_s27 = smov 0   ;;  %s2591_s0 = inlined_call_operand.vmem [shape: f32[2,8,32], index: 0, kind: input, shape index: {}]   ;;  %s2592_s1 = inlined_call_operand.vmem [shape: f32[2,1,8], index: 1, kind: input, shape index: {}]   ;;  %s2593_s2 = inlined_call_operand.vmem [shape: f32[2,32,16], index: 2, kind: input, shape index: {}]   ;;  %s2594_s3 = inlined_call_operand.vmem [shape: f32[2,32,16], index: 3, kind: input, shape index: {}]   ;;  %s2595_s4 = inlined_call_operand.vmem [shape: f32[2,32,16], index: 4, kind: input, shape index: {}]   ;;  %s2596_s5 = inlined_call_operand.vmem [shape: f32[2,1,16], index: 5, kind: input, shape index: {}]   ;;  %s2597_s6 = inlined_call_operand.vmem [shape: f32[2,1,16], index: 6, kind: input, shape index: {}]   ;;  %s2598_s7 = inlined_call_operand.vmem [shape: f32[2,1,16], index: 7, kind: input, shape index: {}]   ;;  %s2599_s8 = inlined_call_operand.vmem [shape: f32[2,16,32], index: 8, kind: input, shape index: {}]   ;;  %s2600_s9 = inlined_call_operand.vmem [shape: f32[1,32], index: 9, kind: input, shape index: {}]   ;;  %s2601_s10 = inlined_call_operand.vmem [shape: f32[1,32], index: 10, kind: input, shape index: {}]   ;;  %s2602_s11 = inlined_call_operand.vmem [shape: f32[1,32], index: 11, kind: input, shape index: {}]   ;;  %s2603_s12 = inlined_call_operand.vmem [shape: f32[32,64], index: 12, kind: input, shape index: {}]   ;;  %s2604_s13 = inlined_call_operand.vmem [shape: f32[1,64], index: 13, kind: input, shape index: {}]   ;;  %s2605_s14 = inlined_call_operand.vmem [shape: f32[64,32], index: 14, kind: input, shape index: {}]   ;;  %s2606_s15 = inlined_call_operand.vmem [shape: f32[1,32], index: 15, kind: input, shape index: {}]   ;;  %s2607_s16 = inlined_call_operand.vmem [shape: f32[1,32], index: 16, kind: input, shape index: {}]   ;;  %s2608_s17 = inlined_call_operand.vmem [shape: f32[1,32], index: 17, kind: input, shape index: {}]   ;;  %s2609_s18 = inlined_call_operand.vmem [shape: f32[2,8,32], index: 18, kind: output, shape index: {}]  }
   0x1   :  { %2611 = sst [smem:[#allocation2_spill]] %s2591_s0 }
   0x2   :  { %2612 = sst [smem:[#allocation3_spill]] %s2592_s1 }
   0x3   :  { %2613 = sst [smem:[#allocation4_spill]] %s2593_s2 }
   0x4 LB: > { %s1880_s28 = sadd.s32 4294967295, %s2215_s27   ;;  %p1884_p0 = scmp.ge.s32.totalorder %s2215_s27, 1  ;;  %s2215_s27 = sphi %s2315_s27, %s28_s27  }
   0x5   : > { %p519_p1 = scmp.lt.s32.totalorder %s2215_s27, 3 }
   0x7   : > { %p520_p2 = pnand %p1884_p0, %p519_p1 }
   0x8   : > { %v672_v0 = vld [vmem:[%s2594_s3] sm:$0xff] (!%p520_p2)  ;;  %v673_v1 = vld [vmem:[%s2594_s3 + $0x8] sm:$0xff] (!%p520_p2)  ;;  %s2614_s21 = sld [smem:[#allocation4_spill]] (!%p520_p2)  ;;  %v2217_v3 = vmov (!%p520_p2), 0.0|0.0   ;;  %v674_v6 = vld [vmem:[%s2594_s3 + $0x10] sm:$0xff] (!%p520_p2)  ;;  %p574_p3 = scmp.lt.s32.totalorder (!%p520_p2), %s1880_s28, 1 }
   0x9   : > { %523 = sbr.rel (%p520_p2) target bundleno = 3035 (0xbdb), region = 92  ;;  %2130 = vmatprep.subr.bf16.mxu1 (!%p520_p2), %v2217_v3  ;;  %v2131_v4 = vpack.c.bf16 (!%p520_p2), %v673_v1, %v672_v0  ;;  %2124 = vmatprep.subr.bf16.mxu0 (!%p520_p2), %v2217_v3  ;;  %v675_v7 = vld [vmem:[%s2594_s3 + $0x18] sm:$0xff] (!%p520_p2)  ;;  %vm2218_vm0 = vmmov (!%p520_p2), 0   ;;  %v2219_v11 = vmov (!%p520_p2), 0.0   ;;  %v753_v14 = vld [vmem:[%s2595_s4] sm:$0xff] (!%p520_p2)  ;;  %v754_v15 = vld [vmem:[%s2595_s4 + $0x8] sm:$0xff] (!%p520_p2) }
   0xa   : > { %2013 = vmatprep.mubr.msk.f32.mxu1 (!%p520_p2), %vm2218_vm0, %v2219_v11  ;;  %2002 = vmatprep.mubr.msk.f32.mxu0 (!%p520_p2), %vm2218_vm0, %v2219_v11  ;;  %v2134_v12 = vpack.c.bf16 (!%p520_p2), %v675_v7, %v674_v6  ;;  %s2615_s26 = sld [smem:[#allocation2_spill]] (!%p520_p2)  ;;  %vm598_vm1 = vcmask (!%p520_p2), 261120   ;;  %v2137_v17 = vpack.c.bf16 (!%p520_p2), %v754_v15, %v753_v14  ;;  %v755_v18 = vld [vmem:[%s2595_s4 + $0x10] sm:$0xff] (!%p520_p2)  ;;  %v756_v19 = vld [vmem:[%s2595_s4 + $0x18] sm:$0xff] (!%p520_p2)  ;;  %v1889_v21 = vld [vmem:[%s2597_s6] ss:$0 sm:$0xff] (!%p520_p2) }
   0xb   : > { %2132 = vmatpush3.bf16.msra.mxu1 (!%p520_p2), %v2131_v4  ;;  %v2140_v20 = vpack.c.bf16 (!%p520_p2), %v756_v19, %v755_v18  ;;  %v1887_v22 = vld [vmem:[%s2596_s5] ss:$0 sm:$0xff] (!%p520_p2)  ;;  %vm834_vm2 = vcmask (!%p520_p2), 130048   ;;  %s2616_s0 = sld [smem:[#allocation3_spill]] (!%p520_p2)  ;;  %vm919_vm3 = vcmask (!%p520_p2), 64512   ;;  %v1905_v52 = vld [vmem:[%s2594_s3 + $0x28] sm:$0xff] (!%p520_p2) }
   0xc   : > { %2133 = vmatprep.subr.bf16.mxu1 (!%p520_p2), %v2217_v3  ;;  %v1891_v29 = vld [vmem:[%s2598_s7] ss:$0 sm:$0xff] (!%p520_p2)  ;;  %v1906_v56 = vld [vmem:[%s2594_s3 + $0x30] sm:$0xff] (!%p520_p2)  ;;  %v1907_v57 = vld [vmem:[%s2594_s3 + $0x38] sm:$0xff] (!%p520_p2)  ;;  %vm1713_vm4 = vcmask (!%p520_p2), 523264  }
   0xd   : > { %v1904_v51 = vld [vmem:[%s2594_s3 + $0x20] sm:$0xff] (!%p520_p2)  ;;  %v2152_v58 = vpack.c.bf16 (!%p520_p2), %v1907_v57, %v1906_v56  ;;  %v1912_v7 = vld [vmem:[%s2595_s4 + $0x28] sm:$0xff] (!%p520_p2) }
   0xe   : > { %v587_v2 = vld [vmem:[%s2614_s21] sm:$0xff] (!%p520_p2)  ;;  %v588_v5 = vld [vmem:[%s2614_s21 + $0x8] sm:$0xff] (!%p520_p2)  ;;  %v589_v9 = vld [vmem:[%s2614_s21 + $0x10] sm:$0xff] (!%p520_p2)  ;;  %v2149_v54 = vpack.c.bf16 (!%p520_p2), %v1905_v52, %v1904_v51 }
   0xf   : > { %v2125_v8 = vpack.c.bf16 (!%p520_p2), %v588_v5, %v587_v2  ;;  %v590_v10 = vld [vmem:[%s2614_s21 + $0x18] sm:$0xff] (!%p520_p2)  ;;  %2135 = vmatpush3.bf16.msra.mxu1 (!%p520_p2), %v2134_v12  ;;  %v1897_v44 = vld [vmem:[%s2614_s21 + $0x20] sm:$0xff] (!%p520_p2)  ;;  %v1898_v45 = vld [vmem:[%s2614_s21 + $0x28] sm:$0xff] (!%p520_p2) }
  0x10   : > { %s2618_s28 = smov (!%p574_p3, %s1880_s28), 1  ;;  %v2128_v13 = vpack.c.bf16 %v590_v10, %v589_v9  ;;  %2032 = vmatprep.subr.mxu1 %v2219_v11  ;;  %v2143_v46 = vpack.c.bf16 %v1898_v45, %v1897_v44  ;;  %v1899_v47 = vld [vmem:[%s2614_s21 + $0x30] sm:$0xff]  ;;  %v1900_v48 = vld [vmem:[%s2614_s21 + $0x38] sm:$0xff]  ;;  %v1909_v63 = vld [vmem:[%s2597_s6 + $0x1] ss:$0 sm:$0xff] }
  0x11   : > { %2126 = vmatpush3.bf16.msra.mxu0 %v2125_v8  ;;  %s1885_s1 = sshll.u32 %s2618_s28, 3  ;;  %s580_s19 = scalar_lea.vmem %s2616_s0, %s2618_s28  ;;  %v2146_v49 = vpack.c.bf16 %v1900_v48, %v1899_v47  ;;  %v1902_v0 = vld [vmem:[%s2596_s5 + $0x1] ss:$0 sm:$0xff]  ;;  %v1913_v8 = vld [vmem:[%s2595_s4 + $0x30] sm:$0xff]  ;;  %v1914_v10 = vld [vmem:[%s2595_s4 + $0x38] sm:$0xff] }
  0x12   : > { %2127 = vmatprep.subr.bf16.mxu0 %v2217_v3  ;;  %s577_s29 = scalar_lea.vmem %s2615_s26, %s1885_s1  ;;  %v2412_v34 = vld [vmem:[%s580_s19] ss:$0 sm:$0xff]  ;;  %v2158_v12 = vpack.c.bf16 %v1914_v10, %v1913_v8  ;;  %v1703_v10 = vld [vmem:[%s2605_s14 + $0x28] sm:$0xff]  ;;  %s584_s22 = scalar_lea.vmem %s2609_s18, %s1885_s1 }
  0x13   : > { %v2369_v16 = vld [vmem:[%s577_s29] sm:$0xff] }
  0x14   : > { %2014 = vmatmul.mubr.msk.f32.vlgmr.msra.gmra.mrb[0].mxu1 %vm598_vm1, %v2369_v16  ;;  %v1911_v6 = vld [vmem:[%s2595_s4 + $0x20] sm:$0xff] }
  0x15   : > { %2129 = vmatpush3.bf16.msra.mxu0 %v2128_v13  ;;  %2034 = vmatprep.mubr.msk.f32.mxu1 %vm2218_vm0, %v2219_v11  ;;  %v2155_v9 = vpack.c.bf16 %v1912_v7, %v1911_v6  ;;  %v1605_v52 = vld [vmem:[%s2603_s12] sm:$0xff]  ;;  %v1700_v6 = vld [vmem:[%s2605_s14 + $0x10] sm:$0xff]  ;;  %v1701_v7 = vld [vmem:[%s2605_s14 + $0x18] sm:$0xff] }
  0x16   : > { %2136 = vmatprep.subr.bf16.mxu0 %v2217_v3  ;;  %v2176_v8 = vpack.c.bf16 %v1701_v7, %v1700_v6 }
  0x18   : > { %2003 = vmatmul.mubr.msk.f32.vlgmr.msra.gmra.mrb[0].mxu0 %vm598_vm1, %v2369_v16 }
  0x19   : > { %2138 = vmatpush3.bf16.msra.mxu0 %v2137_v17  ;;  %2024 = vmatprep.mubr.msk.f32.mxu0 %vm2218_vm0, %v2219_v11 }
  0x1a   : > { %2139 = vmatprep.subr.bf16.mxu0 %v2217_v3 }
  0x1d   : > { %2141 = vmatpush3.bf16.msra.mxu0 %v2140_v20 }
  0x1e   : > { %2027 = vmatprep.subr.mxu0 %v2219_v11 }
  0x20   : > { %2025 = vmatmul.mubr.msk.f32.vlgmr.msra.gmra.mrb[2].mxu0 %vm598_vm1, %v2369_v16 }
  0x21   : > { %2029 = vmatprep.mubr.msk.f32.mxu0 %vm2218_vm0, %v2219_v11 }
  0xe7   : > { %v749_v23 = vpop.f32.mrb[0].mxu1 }
  0xe8   : > { %v750_v24 = vadd.f32 %v1889_v21, %v749_v23  ;;  %v2015_v25 = vpop.f32.mrb[1].mxu1 }
  0xe9   : > { %v1916_v25 = vld [vmem:[%s2598_s7 + $0x1] ss:$0 sm:$0xff] }
  0xea   : > { %2028 = vmatpush3.xpose.msk.msra.mxu0 %vm834_vm2, %v750_v24 }
  0xeb   : > { %v668_v26 = vpop.f32.mrb[0].mxu0  ;;  %2142 = vmatprep.subr.bf16.mxu0 %v2217_v3 }
  0xec   : > { %v669_v27 = vadd.f32 %v1887_v22, %v668_v26  ;;  %v2004_v28 = vpop.f32.mrb[1].mxu0 }
  0xed   : > { %v1921_v28 = vld [vmem:[%s2599_s8 + $0x10] sm:$0xff] }
  0xee   : > { %2030 = vmatmul.mubr.msk.f32.vlgmr.msra.gmra.mrb[4].mxu0 %vm834_vm2, %v669_v27 }
  0xef   : > { %2045 = vmatprep.mubr.msk.f32.mxu0 %vm2218_vm0, %v2219_v11  ;;  %2144 = vmatpush3.bf16.msra.mxu0 %v2143_v46 }
  0xf0   : > { %2145 = vmatprep.subr.bf16.mxu0 %v2217_v3 }
  0xf3   : > { %v830_v30 = vpop.f32.mrb[2].mxu0  ;;  %2147 = vmatpush3.bf16.msra.mxu0 %v2146_v49 }
  0xf4   : > { %v831_v31 = vadd.f32 %v1891_v29, %v830_v30  ;;  %v2026_v32 = vpop.f32.mrb[3].mxu0  ;;  %2154 = vmatprep.subr.bf16.mxu0 %v2217_v3  ;;  %v1922_v29 = vld [vmem:[%s2599_s8 + $0x18] sm:$0xff] }
  0xf5   : > { %v2161_v30 = vpack.c.bf16 %v1922_v29, %v1921_v28  ;;  %v1004_v32 = vld [vmem:[%s2599_s8] sm:$0xff] }
  0xf6   : > { %2033 = vmatpush3.msra.mxu1 %v831_v31  ;;  %2046 = vmatmul.mubr.msk.f32.vlgmr.msra.gmra.mrb[6].mxu0 %vm598_vm1, %v2369_v16 }
  0xf7   : > { %2148 = vmatprep.subr.bf16.mxu1 %v2217_v3  ;;  %2067 = vmatprep.mubr.msk.f32.mxu0 %vm2218_vm0, %v2219_v11 }
  0xf8   : > { %2156 = vmatpush3.bf16.msra.mxu0 %v2155_v9  ;;  %v1702_v9 = vld [vmem:[%s2605_s14 + $0x20] sm:$0xff] }
  0xf9   : > { %2157 = vmatprep.subr.bf16.mxu0 %v2217_v3 }
  0xfc   : > { %2159 = vmatpush3.bf16.msra.mxu0 %v2158_v12  ;;  %v2179_v12 = vpack.c.bf16 %v1703_v10, %v1702_v9 }
  0xfd   : > { %2160 = vmatprep.subr.bf16.mxu0 %v2217_v3 }
  0xff   : > { %2068 = vmatmul.mubr.msk.f32.vlgmr.msra.gmra.mrb[8].mxu0 %vm598_vm1, %v2369_v16 }
 0x100   : > { %2084 = vmatprep.mubr.msk.f32.mxu0 %vm2218_vm0, %v2219_v11  ;;  %2162 = vmatpush3.bf16.msra.mxu0 %v2161_v30 }
 0x101   : > { %2166 = vmatprep.subr.bf16.mxu0 %v2217_v3 }
 0x1c1   : > { %v907_v33 = vpop.f32.mrb[4].mxu0 }
 0x1c2   : > { %v911_v35 = vmul.f32 0.25, %v907_v33  ;;  %v2031_v36 = vpop.f32.mrb[5].mxu0  ;;  %v1005_v33 = vld [vmem:[%s2599_s8 + $0x8] sm:$0xff] }
 0x1c4   : > { %v918_v37 = vadd.f32 %v2412_v34, %v911_v35  ;;  %v2164_v35 = vpack.c.bf16 %v1005_v33, %v1004_v32 }
 0x1c6   : > { %v920_v38 = vsel %vm919_vm3, %v918_v37, -inf }
 0x1c7   : > { %921 = vmax.xlane.f32.xlu0 %v920_v38 }
 0x1c9   : > { %v1085_v59 = vpop.f32.mrb[6].mxu0 }
 0x1ca   : > { %v2047_v60 = vpop.f32.mrb[7].mxu0  ;;  %v1086_v5 = vadd.f32 %v1902_v0, %v1085_v59 }
 0x1d2   : > { %v1251_v24 = vpop.f32.mrb[8].mxu0 }
 0x1d3   : > { %v2069_v26 = vpop.f32.mrb[9].mxu0  ;;  %v1252_v27 = vadd.f32 %v1916_v25, %v1251_v24 }
 0x254   : > { %v922_v39 = vpop.xlane.xlu0 %921 }
 0x255   : > { %v923_v40 = vsub.f32 %v918_v37, %v922_v39 }
 0x257   : > { %v924_v41 = vmul.f32 1.442695, %v923_v40 }
 0x259   : > { %2195 = vpow2.f32 %v924_v41 }
 0x263   : > { %v2196_v42 = vpop.eup %2195 }
 0x264   : > { %v926_v43 = vsel %vm919_vm3, %v2196_v42, 0.0 }
 0x265   : > { %927 = vadd.xlane.f32.xlu0 %v926_v43 }
 0x2f2   : > { %v928_v50 = vpop.xlane.xlu0 %927 }
 0x2f3   : > { %2197 = vrcp.f32 %v928_v50 }
 0x2fd   : > { %v2198_v53 = vpop.eup %2197 }
 0x2fe   : > { %v930_v55 = vmul.f32 %v2198_v53, %v2196_v42  ;;  %v1925_v42 = vld [vmem:[%s2600_s9] ss:$0 sm:$0xff]  ;;  %v1606_v53 = vld [vmem:[%s2603_s12 + $0x8] sm:$0xff] }
 0x300   : > { %2035 = vmatmul.mubr.msk.f32.vlgmr.msra.gmra.mrb[2].mxu1 %vm919_vm3, %v930_v55  ;;  %v1608_v55 = vld [vmem:[%s2603_s12 + $0x18] sm:$0xff] }
 0x301   : > { %2150 = vmatpush3.bf16.msra.mxu1 %v2149_v54  ;;  %2056 = vmatprep.mubr.msk.f32.mxu1 %vm2218_vm0, %v2219_v11  ;;  %v2167_v54 = vpack.c.bf16 %v1606_v53, %v1605_v52 }
 0x302   : > { %2151 = vmatprep.subr.bf16.mxu1 %v2217_v3 }
 0x305   : > { %2153 = vmatpush3.bf16.msra.mxu1 %v2152_v58 }
 0x306   : > { %2070 = vmatprep.subr.mxu1 %v2219_v11 }
 0x308   : > { %2057 = vmatmul.mubr.msk.f32.vlgmr.msra.gmra.mrb[4].mxu1 %vm598_vm1, %v2369_v16 }
 0x309   : > { %2072 = vmatprep.mubr.msk.f32.mxu1 %vm2218_vm0, %v2219_v11 }
 0x3d3   : > { %v1000_v61 = vpop.f32.mrb[2].mxu1 }
 0x3d4   : > { %v2036_v62 = vpop.f32.mrb[3].mxu1 }
 0x3db   : > { %v1168_v1 = vpop.f32.mrb[4].mxu1 }
 0x3dc   : > { %v1169_v2 = vadd.f32 %v1909_v63, %v1168_v1  ;;  %v2058_v4 = vpop.f32.mrb[5].mxu1  ;;  %v1927_v63 = vld [vmem:[%s2602_s11] ss:$0 sm:$0xff] }
 0x3dd   : > { %v1699_v4 = vld [vmem:[%s2605_s14 + $0x8] sm:$0xff] }
 0x3de   : > { %2071 = vmatpush3.xpose.msk.msra.mxu1 %vm834_vm2, %v1169_v2  ;;  %v1698_v2 = vld [vmem:[%s2605_s14] sm:$0xff] }
 0x3df   : > { %2075 = vmatprep.subr.mxu1 %v2219_v11 }
 0x3e1   : > { %2073 = vmatmul.mubr.msk.f32.vlgmr.msra.gmra.mrb[6].mxu1 %vm834_vm2, %v1086_v5  ;;  %v2173_v5 = vpack.c.bf16 %v1699_v4, %v1698_v2 }
 0x3e2   : > { %2077 = vmatprep.mubr.msk.f32.mxu1 %vm2218_vm0, %v2219_v11  ;;  %2076 = vmatpush3.msra.mxu1 %v1252_v27 }
 0x3e3   : > { %2163 = vmatprep.subr.bf16.mxu1 %v2217_v3 }
 0x4b4   : > { %v1327_v13 = vpop.f32.mrb[6].mxu1 }
 0x4b5   : > { %v1331_v14 = vmul.f32 0.25, %v1327_v13  ;;  %v2074_v15 = vpop.f32.mrb[7].mxu1  ;;  %v1704_v13 = vld [vmem:[%s2605_s14 + $0x30] sm:$0xff] }
 0x4b7   : > { %v1332_v17 = vadd.f32 %v2412_v34, %v1331_v14  ;;  %v1705_v14 = vld [vmem:[%s2605_s14 + $0x38] sm:$0xff] }
 0x4b8   : > { %v2182_v15 = vpack.c.bf16 %v1705_v14, %v1704_v13 }
 0x4b9   : > { %v1333_v18 = vsel %vm919_vm3, %v1332_v17, -inf }
 0x4ba   : > { %1334 = vmax.xlane.f32.xlu1 %v1333_v18 }
 0x547   : > { %v1335_v19 = vpop.xlane.xlu1 %1334 }
 0x548   : > { %v1336_v20 = vsub.f32 %v1332_v17, %v1335_v19  ;;  %v1928_v17 = vld [vmem:[%s2604_s13] ss:$0 sm:$0xff] }
 0x54a   : > { %v1337_v21 = vmul.f32 1.442695, %v1336_v20 }
 0x54c   : > { %2199 = vpow2.f32 %v1337_v21 }
 0x556   : > { %v2200_v22 = vpop.eup %2199 }
 0x557   : > { %v1339_v23 = vsel %vm919_vm3, %v2200_v22, 0.0 }
 0x558   : > { %1340 = vadd.xlane.f32.xlu1 %v1339_v23 }
 0x5e5   : > { %v1341_v31 = vpop.xlane.xlu1 %1340 }
 0x5e6   : > { %2201 = vrcp.f32 %v1341_v31 }
 0x5f0   : > { %v2202_v34 = vpop.eup %2201 }
 0x5f1   : > { %v1343_v36 = vmul.f32 %v2202_v34, %v2200_v22 }
 0x5f3   : > { %2078 = vmatmul.mubr.msk.f32.vlgmr.msra.gmra.mrb[8].mxu1 %vm919_vm3, %v1343_v36 }
 0x5f4   : > { %2165 = vmatpush3.bf16.msra.mxu1 %v2164_v35  ;;  %2091 = vmatprep.mubr.msk.f32.mxu1 %vm2218_vm0, %v2219_v11 }
 0x5f5   : > { %2172 = vmatprep.subr.bf16.mxu1 %v2217_v3 }
 0x5f7   : > { %2092 = vmatmul.mubr.msk.f32.vlgmr.msra.gmra.mrb[10].mxu1 %vm834_vm2, %v1000_v61  ;;  %v1926_v61 = vld [vmem:[%s2601_s10] ss:$0 sm:$0xff] }
 0x5f8   : > { %2121 = vmatprep.mubr.msk.f32.mxu1 %vm2218_vm0, %v2219_v11  ;;  %2174 = vmatpush3.bf16.msra.mxu1 %v2173_v5 }
 0x5f9   : > { %2175 = vmatprep.subr.bf16.mxu1 %v2217_v3 }
 0x5fc   : > { %2177 = vmatpush3.bf16.msra.mxu1 %v2176_v8 }
 0x5fd   : > { %2178 = vmatprep.subr.bf16.mxu1 %v2217_v3 }
 0x600   : > { %2180 = vmatpush3.bf16.msra.mxu1 %v2179_v12 }
 0x601   : > { %2181 = vmatprep.subr.bf16.mxu1 %v2217_v3 }
 0x604   : > { %2183 = vmatpush3.bf16.msra.mxu1 %v2182_v15 }
 0x6c6   : > { %v1413_v37 = vpop.f32.mrb[8].mxu1 }
 0x6c7   : > { %v2079_v38 = vpop.f32.mrb[9].mxu1  ;;  %2085 = vmatmul.mubr.msk.f32.vlgmr.msra.gmra.mrb[10].mxu0 %vm834_vm2, %v1413_v37 }
 0x6c8   : > { %2102 = vmatprep.mubr.msk.f32.mxu0 %vm2218_vm0, %v2219_v11  ;;  %2168 = vmatpush3.bf16.msra.mxu0 %v2167_v54 }
 0x6c9   : > { %2169 = vmatprep.subr.bf16.mxu0 %v2217_v3  ;;  %v1930_v3 = vld [vmem:[%s2606_s15] ss:$0 sm:$0xff] }
 0x6ca   : > { %v1562_v39 = vpop.f32.mrb[10].mxu1 }
 0x6cb   : > { %v2093_v40 = vpop.f32.mrb[11].mxu1 }
 0x79a   : > { %v1489_v41 = vpop.f32.mrb[10].mxu0 }
 0x79b   : > { %v1563_v43 = vadd.f32 %v1562_v39, %v1489_v41  ;;  %v2086_v44 = vpop.f32.mrb[11].mxu0 }
 0x79c   : > { %v1932_v44 = vld [vmem:[%s2607_s16] ss:$0 sm:$0xff] }
 0x79d   : > { %v1573_v45 = vadd.f32 %v1925_v42, %v1563_v43 }
 0x79f   : > { %v1574_v46 = vadd.f32 %v1573_v45, %v2369_v16  ;;  %v1607_v16 = vld [vmem:[%s2603_s12 + $0x10] sm:$0xff] }
 0x7a0   : > { %v2170_v56 = vpack.c.bf16 %v1608_v55, %v1607_v16 }
 0x7a1   : > { %v1577_v47 = vsel %vm598_vm1, %v1574_v46, 0.0 }
 0x7a2   : > { %1578 = vadd.xlane.f32.xlu0 %v1577_v47  ;;  %2171 = vmatpush3.bf16.msra.mxu0 %v2170_v56 }
 0x82f   : > { %v1579_v48 = vpop.xlane.xlu0 %1578 }
 0x830   : > { %v1581_v49 = vmul.f32 0.03125, %v1579_v48 }
 0x832   : > { %v1582_v50 = vsub.f32 %v1574_v46, %v1581_v49  ;;  %v1933_v46 = vld [vmem:[%s2608_s17] ss:$0 sm:$0xff] }
 0x834   : > { %v1583_v51 = vmul.f32 %v1582_v50, %v1582_v50 }
 0x836   : > { %v1584_v11 = vsel %vm598_vm1, %v1583_v51, 0.0 }
 0x837   : > { %1585 = vadd.xlane.f32.xlu1 %v1584_v11 }
 0x8c4   : > { %v1586_v57 = vpop.xlane.xlu1 %1585 }
 0x8c5   : > { %v1587_v58 = vmul.f32 0.03125, %v1586_v57 }
 0x8c7   : > { %v1588_v59 = vadd.f32 1e-12, %v1587_v58 }
 0x8c9   : > { %2203 = vrsqrt.f32 %v1588_v59 }
 0x8d3   : > { %v2204_v60 = vpop.eup %2203 }
 0x8d4   : > { %v1590_v62 = vmul.f32 %v2204_v60, %v1582_v50 }
 0x8d6   : > { %v1597_v0 = vmul.f32 %v1926_v61, %v1590_v62 }
 0x8d8   : > { %v1604_v1 = vadd.f32 %v1927_v63, %v1597_v0 }
 0x8da   : > { %2103 = vmatmul.mubr.msk.f32.vlgmr.msra.gmra.mrb[12].mxu0 %vm598_vm1, %v1604_v1 }
 0x9ad   : > { %v1685_v18 = vpop.f32.mrb[12].mxu0 }
 0x9ae   : > { %v1686_v19 = vadd.f32 %v1928_v17, %v1685_v18  ;;  %v2104_v20 = vpop.f32.mrb[13].mxu0 }
 0x9b0   : > { %v1690_v21 = vmul.f32 0.044715, %v1686_v19  ;;  %v1689_v27 = vmul.f32 0.5, %v1686_v19 }
 0x9b2   : > { %v1691_v22 = vmul.f32 %v1690_v21, %v1686_v19 }
 0x9b4   : > { %v1692_v23 = vmul.f32 %v1691_v22, %v1686_v19 }
 0x9b6   : > { %v1693_v24 = vadd.f32 %v1692_v23, %v1686_v19 }
 0x9b8   : > { %v1694_v25 = vmul.f32 0.7978846, %v1693_v24 }
 0x9ba   : > { %2205 = vtanh.f32 %v1694_v25 }
 0x9c4   : > { %v2206_v26 = vpop.eup %2205 }
 0x9c5   : > { %v1696_v28 = vadd.f32 1.0, %v2206_v26 }
 0x9c7   : > { %v1697_v29 = vmul.f32 %v1696_v28, %v1689_v27 }
 0x9c9   : > { %2122 = vmatmul.mubr.msk.f32.vlgmr.msra.gmra.mrb[12].mxu1 %vm1713_vm4, %v1697_v29 }
 0xa9c   : > { %v1783_v30 = vpop.f32.mrb[12].mxu1 }
 0xa9d   : > { %v1784_v31 = vadd.f32 %v1930_v3, %v1783_v30  ;;  %v2123_v32 = vpop.f32.mrb[13].mxu1 }
 0xa9f   : > { %v1787_v33 = vadd.f32 %v1784_v31, %v1604_v1 }
 0xaa1   : > { %v1790_v34 = vsel %vm598_vm1, %v1787_v33, 0.0 }
 0xaa2   : > { %1791 = vadd.xlane.f32.xlu0 %v1790_v34 }
 0xb2f   : > { %v1792_v35 = vpop.xlane.xlu0 %1791 }
 0xb30   : > { %v1793_v36 = vmul.f32 0.03125, %v1792_v35 }
 0xb32   : > { %v1794_v37 = vsub.f32 %v1787_v33, %v1793_v36 }
 0xb34   : > { %v1795_v38 = vmul.f32 %v1794_v37, %v1794_v37 }
 0xb36   : > { %v1796_v39 = vsel %vm598_vm1, %v1795_v38, 0.0 }
 0xb37   : > { %1797 = vadd.xlane.f32.xlu1 %v1796_v39 }
 0xbc4   : > { %v1798_v40 = vpop.xlane.xlu1 %1797 }
 0xbc5   : > { %v1799_v41 = vmul.f32 0.03125, %v1798_v40 }
 0xbc7   : > { %v1800_v42 = vadd.f32 1e-12, %v1799_v41 }
 0xbc9   : > { %2207 = vrsqrt.f32 %v1800_v42 }
 0xbd3   : > { %v2208_v43 = vpop.eup %2207 }
 0xbd4   : > { %v1802_v45 = vmul.f32 %v2208_v43, %v1794_v37 }
 0xbd6   : > { %v1809_v47 = vmul.f32 %v1932_v44, %v1802_v45 }
 0xbd8   : > { %v1816_v48 = vadd.f32 %v1933_v46, %v1809_v47 }
 0xbda   : > { %1817 = vst.msk [vmem:[%s584_s22] sm:$0xff] %vm598_vm1, %v1816_v48 }
 0xbdb PF: > { %s28_s27 = sadd.s32 1, %s2215_s27  }
 0xbdc   : > { %p25_p4 = scmp.ge.s32.totalorder %s28_s27, 4  }
 0xbde   :  { %27 = sbr.rel (!%p25_p4) target bundleno = 4 (0x4), region = 132 }

</bundles_post_ra>
